<compile_context>
chip_gen: v6e
topology: v6e:2x2x1
jax: 0.10.0
libtpu: 0.0.40
codegen_flags: <defaults>
</compile_context>

<pallas_src>
import functools
import math

import jax
import jax.numpy as jnp
from jax.experimental import pallas as pl
from jax.experimental.pallas import tpu as pltpu

LANE = 128           # TPU lane width (last-dim granularity)
SUBLANE_BF16 = 16    # bf16 packs 16 rows per vreg sublane group


def _round_up(x, m):
    return ((x + m - 1) // m) * m


def _fused_mlp_kernel(*refs, num_layers):
    """refs = (x_ref, w0, b0, w1, b1, ..., w_{L-1}, b_{L-1}, o_ref).

    Chains all Linear(+ReLU) layers on one row tile entirely on-chip.
    """
    x_ref = refs[0]
    o_ref = refs[-1]
    h = x_ref[...]                                            # (TM, Din0) bf16
    for l in range(num_layers):
        w_ref = refs[1 + 2 * l]                               # (Din_l, Dout_l) bf16, VMEM-resident
        b_ref = refs[2 + 2 * l]                               # (1, Dout_l) f32,  VMEM-resident
        y = jnp.dot(h, w_ref[...], preferred_element_type=jnp.float32)  # MXU, f32 acc
        y = y + b_ref[...]                                    # bias broadcast in f32
        if l < num_layers - 1:
            h = jnp.maximum(y, 0.0).astype(x_ref.dtype)       # ReLU, back to bf16 for next MXU pass
        else:
            o_ref[...] = y.astype(o_ref.dtype)                # bf16 store (lane-dense)


def fused_mlp(x_pad, w_list, b_list, *, block_rows, out_dtype,
              vmem_limit_bytes, cost_estimate):
    """x_pad: (M_pad, Din0) bf16; w_list[l]: (Din_l, Dout_l) bf16; b_list[l]: (1, Dout_l) f32."""
    m_pad, d_in0 = x_pad.shape
    num_layers = len(w_list)
    d_out = w_list[-1].shape[1]
    assert m_pad % block_rows == 0
    grid_m = m_pad // block_rows

    # Whole-array VMEM residency: copied in once, single-buffered (constant
    # index would otherwise still allocate a useless second pipeline buffer).
    resident = pl.BlockSpec(memory_space=pltpu.MemorySpace.VMEM)

    in_specs = [pl.BlockSpec((block_rows, d_in0), lambda i: (i, 0))]   # activation row tile
    operands = [x_pad]
    for w, b in zip(w_list, b_list):
        in_specs += [resident, resident]
        operands += [w, b]

    kernel = functools.partial(_fused_mlp_kernel, num_layers=num_layers)
    return pl.pallas_call(
        kernel,
        out_shape=jax.ShapeDtypeStruct((m_pad, d_out), out_dtype),
        grid_spec=pltpu.PrefetchScalarGridSpec(
            num_scalar_prefetch=0,
            grid=(grid_m,),
            in_specs=in_specs,
            out_specs=pl.BlockSpec((block_rows, d_out), lambda i: (i, 0)),
        ),
        compiler_params=pltpu.CompilerParams(
            dimension_semantics=("parallel",),     # shard row tiles across TCs on v7x
            vmem_limit_bytes=vmem_limit_bytes,
        ),
        cost_estimate=cost_estimate,
    )(*operands)


class MLPPallas:
    """Mirror of the PyTorch MLP: num_layers Linear layers, ReLU on all but the last."""

    def __init__(self, input_dim, hidden_dim, output_dim, num_layers, key,
                 compute_dtype=jnp.bfloat16, out_dtype=jnp.bfloat16):
        self.num_layers = num_layers
        self.input_dim = input_dim
        self.output_dim = output_dim
        self.compute_dtype = compute_dtype
        self.out_dtype = out_dtype

        h = [hidden_dim] * (num_layers - 1)
        dims_in = [input_dim] + h
        dims_out = h + [output_dim]

        # Per-layer padding to (round_up(in,128), round_up(out,128)).  Padded
        # weight rows/cols and bias entries are exactly 0, and layer l's padded
        # output columns align with layer l+1's padded (zero) input rows, so
        # the padding is exact through every ReLU.
        # TODO(synk): on v6e/v7x, production hidden dims (>128) could be padded
        # to multiples of 256 to fully fill the 256x256 MXU; toy dims stay 128.
        self.w_list, self.b_list = [], []
        for n, k in zip(dims_in, dims_out):
            key, wkey, bkey = jax.random.split(key, 3)
            # same spirit as nn.Linear's uniform(-1/sqrt(n), 1/sqrt(n)) init
            bound = 1.0 / math.sqrt(n)
            w = jax.random.uniform(wkey, (n, k), jnp.float32, -bound, bound)  # (in, out)
            b = jax.random.uniform(bkey, (k,), jnp.float32, -bound, bound)
            dn, dk = _round_up(n, LANE), _round_up(k, LANE)
            w_pad = jnp.zeros((dn, dk), jnp.float32).at[:n, :k].set(w)
            b_pad = jnp.zeros((1, dk), jnp.float32).at[0, :k].set(b)
            self.w_list.append(w_pad.astype(compute_dtype))   # bf16 MXU operand
            self.b_list.append(b_pad)                         # f32 bias (added post-MXU)

        self.d_in0 = self.w_list[0].shape[0]
        self.d_out = self.w_list[-1].shape[1]

    def __call__(self, x, *, block_rows=256):
        lead = x.shape[:-1]
        x2d = x.reshape(-1, x.shape[-1])
        m = x2d.shape[0]

        # Row-tile selection: 16-row alignment (bf16 sublane packing), tile at
        # most `block_rows`, and guarantee >=2 grid steps whenever M allows so
        # the "parallel" axis can split across v7x's two TensorCores.
        m16 = _round_up(max(m, 1), SUBLANE_BF16)
        tm = min(block_rows, m16)
        if m16 >= 2 * SUBLANE_BF16:
            tm = min(tm, max(SUBLANE_BF16, (m16 // 2) // SUBLANE_BF16 * SUBLANE_BF16))
        grid_m = pl.cdiv(m16, tm)
        m_pad = grid_m * tm

        # Single bf16 cast of the small raw input + one bf16 pad: no padded f32
        # intermediate written to / re-read from HBM.
        x_bf = x2d.astype(self.compute_dtype)
        x_pad = jnp.pad(x_bf, ((0, m_pad - m), (0, self.d_in0 - self.input_dim)))

        # Explicit VMEM budget: resident (single-buffered) weights + biases,
        # plus double-buffered input/output row tiles, with headroom.  Clamped
        # to [32 MiB, 64 MiB] so it is valid on v5e/v6e/v7x alike.
        weight_bytes = sum(w.size * w.dtype.itemsize for w in self.w_list)
        bias_bytes = sum(b.size * b.dtype.itemsize for b in self.b_list)
        out_itemsize = jnp.dtype(self.out_dtype).itemsize
        act_bytes = 2 * tm * self.d_in0 * 2 + 2 * tm * self.d_out * out_itemsize
        needed = weight_bytes + bias_bytes + act_bytes
        vmem_limit = min(64 * 1024 * 1024,
                         max(32 * 1024 * 1024, int(1.5 * needed) + (2 << 20)))

        flops = 2 * m_pad * sum(w.shape[0] * w.shape[1] for w in self.w_list)
        bytes_accessed = (x_pad.size * 2 + weight_bytes + bias_bytes
                          + m_pad * self.d_out * out_itemsize)
        cost = pl.CostEstimate(flops=flops, transcendentals=0,
                               bytes_accessed=bytes_accessed)

        out = fused_mlp(x_pad, self.w_list, self.b_list, block_rows=tm,
                        out_dtype=self.out_dtype, vmem_limit_bytes=vmem_limit,
                        cost_estimate=cost)
        return out[:m, : self.output_dim].reshape(*lead, self.output_dim)


def mlp_reference(x, w_list, b_list, input_dim, output_dim, compute_dtype, out_dtype):
    """Pure-JAX reference mirroring the kernel math (bf16 operands, f32 accumulate)."""
    lead = x.shape[:-1]
    num_layers = len(w_list)
    h = x.reshape(-1, x.shape[-1]).astype(compute_dtype)
    h = jnp.pad(h, ((0, 0), (0, w_list[0].shape[0] - input_dim)))
    y = None
    for l in range(num_layers):
        y = jnp.dot(h, w_list[l], preferred_element_type=jnp.float32) + b_list[l]
        if l < num_layers - 1:
            h = jnp.maximum(y, 0.0).astype(compute_dtype)
    out = y.astype(out_dtype)
    return out[:, :output_dim].reshape(*lead, output_dim)


if __name__ == "__main__":
    key = jax.random.PRNGKey(0)
    key, xkey, pkey = jax.random.split(key, 3)

    # Small shapes consistent with how CtRL-C uses this MLP: (batch, seq, feat)
    batch, seq = 2, 8
    input_dim, hidden_dim, output_dim, num_layers = 32, 64, 16, 3

    x = jax.random.normal(xkey, (batch, seq, input_dim), jnp.float32)

    mlp = MLPPallas(input_dim, hidden_dim, output_dim, num_layers, pkey)
    out = jax.block_until_ready(mlp(x))

    ref = mlp_reference(x, mlp.w_list, mlp.b_list, input_dim, output_dim,
                        mlp.compute_dtype, mlp.out_dtype)
    assert out.shape == (batch, seq, output_dim), out.shape
    err = float(jnp.max(jnp.abs(out.astype(jnp.float32) - ref.astype(jnp.float32))))
    assert err < 1e-2, err

    print("KERNEL_OK")
</pallas_src>

<mosaic_0001>
module attributes {stable_mosaic.version = 11 : i64} {
  func.func @_fused_mlp_kernel(%arg0: i32, %arg1: memref<16x128xbf16, #tpu.memory_space<vmem>>, %arg2: memref<128x128xbf16, #tpu.memory_space<vmem>>, %arg3: memref<1x128xf32, #tpu.memory_space<vmem>>, %arg4: memref<128x128xbf16, #tpu.memory_space<vmem>>, %arg5: memref<1x128xf32, #tpu.memory_space<vmem>>, %arg6: memref<128x128xbf16, #tpu.memory_space<vmem>>, %arg7: memref<1x128xf32, #tpu.memory_space<vmem>>, %arg8: memref<16x128xbf16, #tpu.memory_space<vmem>>) attributes {dimension_semantics = [#tpu.dimension_semantics<parallel>], iteration_bounds = array<i64: 1>, scalar_prefetch = 0 : i64, scratch_operands = 0 : i64, tpu.core_type = #tpu.core_type<tc>, window_params = [{transform_indices = @transform_0, window_bounds = array<i64: 16, 128>}, {pipeline_mode = #tpu.pipeline_mode<synchronous>, transform_indices = @transform_1, window_bounds = array<i64: 128, 128>}, {pipeline_mode = #tpu.pipeline_mode<synchronous>, transform_indices = @transform_2, window_bounds = array<i64: 1, 128>}, {pipeline_mode = #tpu.pipeline_mode<synchronous>, transform_indices = @transform_3, window_bounds = array<i64: 128, 128>}, {pipeline_mode = #tpu.pipeline_mode<synchronous>, transform_indices = @transform_4, window_bounds = array<i64: 1, 128>}, {pipeline_mode = #tpu.pipeline_mode<synchronous>, transform_indices = @transform_5, window_bounds = array<i64: 128, 128>}, {pipeline_mode = #tpu.pipeline_mode<synchronous>, transform_indices = @transform_6, window_bounds = array<i64: 1, 128>}, {transform_indices = @transform_7, window_bounds = array<i64: 16, 128>}]} {
    %c0 = arith.constant 0 : index
    %c0_0 = arith.constant 0 : index
    %0 = vector.load %arg1[%c0, %c0_0] : memref<16x128xbf16, #tpu.memory_space<vmem>>, vector<16x128xbf16>
    %c0_1 = arith.constant 0 : index
    %c0_2 = arith.constant 0 : index
    %1 = vector.load %arg2[%c0_1, %c0_2] : memref<128x128xbf16, #tpu.memory_space<vmem>>, vector<128x128xbf16>
    %cst = arith.constant dense<0.000000e+00> : vector<16x128xf32>
    %2 = tpu.matmul %0, %1, %cst {dimension_numbers = #tpu.dot_dimension_numbers<[1], [0], [0], [1], [0, 0, 1, 1], [], []>} : vector<16x128xbf16>, vector<128x128xbf16>, vector<16x128xf32> -> vector<16x128xf32>
    %c0_3 = arith.constant 0 : index
    %c0_4 = arith.constant 0 : index
    %3 = vector.load %arg3[%c0_3, %c0_4] : memref<1x128xf32, #tpu.memory_space<vmem>>, vector<1x128xf32>
    %4 = vector.broadcast %3 : vector<1x128xf32> to vector<16x128xf32>
    %5 = arith.addf %2, %4 : vector<16x128xf32>
    %cst_5 = arith.constant 0.000000e+00 : f32
    %6 = vector.broadcast %cst_5 : f32 to vector<16x128xf32>
    %7 = arith.maximumf %5, %6 : vector<16x128xf32>
    %8 = arith.truncf %7 : vector<16x128xf32> to vector<16x128xbf16>
    %c0_6 = arith.constant 0 : index
    %c0_7 = arith.constant 0 : index
    %9 = vector.load %arg4[%c0_6, %c0_7] : memref<128x128xbf16, #tpu.memory_space<vmem>>, vector<128x128xbf16>
    %cst_8 = arith.constant dense<0.000000e+00> : vector<16x128xf32>
    %10 = tpu.matmul %8, %9, %cst_8 {dimension_numbers = #tpu.dot_dimension_numbers<[1], [0], [0], [1], [0, 0, 1, 1], [], []>} : vector<16x128xbf16>, vector<128x128xbf16>, vector<16x128xf32> -> vector<16x128xf32>
    %c0_9 = arith.constant 0 : index
    %c0_10 = arith.constant 0 : index
    %11 = vector.load %arg5[%c0_9, %c0_10] : memref<1x128xf32, #tpu.memory_space<vmem>>, vector<1x128xf32>
    %12 = vector.broadcast %11 : vector<1x128xf32> to vector<16x128xf32>
    %13 = arith.addf %10, %12 : vector<16x128xf32>
    %cst_11 = arith.constant 0.000000e+00 : f32
    %14 = vector.broadcast %cst_11 : f32 to vector<16x128xf32>
    %15 = arith.maximumf %13, %14 : vector<16x128xf32>
    %16 = arith.truncf %15 : vector<16x128xf32> to vector<16x128xbf16>
    %c0_12 = arith.constant 0 : index
    %c0_13 = arith.constant 0 : index
    %17 = vector.load %arg6[%c0_12, %c0_13] : memref<128x128xbf16, #tpu.memory_space<vmem>>, vector<128x128xbf16>
    %cst_14 = arith.constant dense<0.000000e+00> : vector<16x128xf32>
    %18 = tpu.matmul %16, %17, %cst_14 {dimension_numbers = #tpu.dot_dimension_numbers<[1], [0], [0], [1], [0, 0, 1, 1], [], []>} : vector<16x128xbf16>, vector<128x128xbf16>, vector<16x128xf32> -> vector<16x128xf32>
    %c0_15 = arith.constant 0 : index
    %c0_16 = arith.constant 0 : index
    %19 = vector.load %arg7[%c0_15, %c0_16] : memref<1x128xf32, #tpu.memory_space<vmem>>, vector<1x128xf32>
    %20 = vector.broadcast %19 : vector<1x128xf32> to vector<16x128xf32>
    %21 = arith.addf %18, %20 : vector<16x128xf32>
    %22 = arith.truncf %21 : vector<16x128xf32> to vector<16x128xbf16>
    %c0_17 = arith.constant 0 : index
    %c0_18 = arith.constant 0 : index
    %23 = vector.load %arg8[%c0_17, %c0_18] : memref<16x128xbf16, #tpu.memory_space<vmem>>, vector<16x128xbf16>
    tpu.vector_store %arg8[%c0_17, %c0_18], %22 {strides = array<i32>} : memref<16x128xbf16, #tpu.memory_space<vmem>>, vector<16x128xbf16>,
    return
  }
  func.func @transform_0(%arg0: i32) -> (i32, i32) {
    %c0_i32 = arith.constant 0 : i32
    %c0_i32_0 = arith.constant 0 : i32
    return %arg0, %c0_i32 : i32, i32
  }
  func.func @transform_1(%arg0: i32) -> (i32, i32) {
    %c0_i32 = arith.constant 0 : i32
    %c0_i32_0 = arith.constant 0 : i32
    %c0_i32_1 = arith.constant 0 : i32
    return %c0_i32, %c0_i32_0 : i32, i32
  }
  func.func @transform_2(%arg0: i32) -> (i32, i32) {
    %c0_i32 = arith.constant 0 : i32
    %c0_i32_0 = arith.constant 0 : i32
    %c0_i32_1 = arith.constant 0 : i32
    return %c0_i32, %c0_i32_0 : i32, i32
  }
  func.func @transform_3(%arg0: i32) -> (i32, i32) {
    %c0_i32 = arith.constant 0 : i32
    %c0_i32_0 = arith.constant 0 : i32
    %c0_i32_1 = arith.constant 0 : i32
    return %c0_i32, %c0_i32_0 : i32, i32
  }
  func.func @transform_4(%arg0: i32) -> (i32, i32) {
    %c0_i32 = arith.constant 0 : i32
    %c0_i32_0 = arith.constant 0 : i32
    %c0_i32_1 = arith.constant 0 : i32
    return %c0_i32, %c0_i32_0 : i32, i32
  }
  func.func @transform_5(%arg0: i32) -> (i32, i32) {
    %c0_i32 = arith.constant 0 : i32
    %c0_i32_0 = arith.constant 0 : i32
    %c0_i32_1 = arith.constant 0 : i32
    return %c0_i32, %c0_i32_0 : i32, i32
  }
  func.func @transform_6(%arg0: i32) -> (i32, i32) {
    %c0_i32 = arith.constant 0 : i32
    %c0_i32_0 = arith.constant 0 : i32
    %c0_i32_1 = arith.constant 0 : i32
    return %c0_i32, %c0_i32_0 : i32, i32
  }
  func.func @transform_7(%arg0: i32) -> (i32, i32) {
    %c0_i32 = arith.constant 0 : i32
    %c0_i32_0 = arith.constant 0 : i32
    return %arg0, %c0_i32 : i32, i32
  }
}

</mosaic_0001>

<bundles_post_ra>
// kernel: tpu_custom_call.1
= control target key start
LH: loop header
LB: loop body
LE: loop exit
PB: predicated region body
PF: predicated region fallthrough
CT: control target
= control target key end

     0   :  { %12 = vsyncpa [#allocation3], 0  ;;  %s846_s0 = inlined_call_operand.hbm [shape: bf16[16,128], index: 0, kind: input, shape index: {}]   ;;  %s847_s1 = inlined_call_operand.hbm [shape: bf16[128,128], index: 1, kind: input, shape index: {}]   ;;  %s848_s2 = inlined_call_operand.vmem [shape: f32[1,128], index: 2, kind: input, shape index: {}]   ;;  %s849_s3 = inlined_call_operand.hbm [shape: bf16[128,128], index: 3, kind: input, shape index: {}]   ;;  %s850_s4 = inlined_call_operand.vmem [shape: f32[1,128], index: 4, kind: input, shape index: {}]   ;;  %s851_s5 = inlined_call_operand.hbm [shape: bf16[128,128], index: 5, kind: input, shape index: {}]   ;;  %s852_s6 = inlined_call_operand.vmem [shape: f32[1,128], index: 6, kind: input, shape index: {}]   ;;  %s853_s7 = inlined_call_operand.hbm [shape: bf16[16,128], index: 7, kind: output, shape index: {}]  }
   0x1   :  { %13 = vsyncpa [#allocation6], 0 }
   0x2   :  { %14 = vsyncpa [#allocation9], 0 }
   0x3   :  { %15 = vsyncpa [#allocation4], 0  ;;  %s728_s24 = smov [#allocation5]   ;;  %s729_s26 = smov [#allocation2]  }
   0x4   :  { %s33_s25 = sshll.u32 %s728_s24, 4  ;;  %s21_s27 = sshll.u32 %s729_s26, 4  ;;  %s34_s25 = int_to_ptr.vmem [resolvable:$true] %s33_s25  ;;  %s22_s27 = int_to_ptr.vmem [resolvable:$true] %s21_s27 }
   0x5   :  { %s628_s28 = scalar_lea.vmem %s34_s25, 1024  ;;  %p633_p1 = scmp.lt.s32.totalorder %s34_s25, %s34_s25 }
   0x6   :  { %p629_p0 = scmp.ne.s32.totalorder %s34_s25, %s628_s28  ;;  %p634_p2 = scmp.lt.s32.totalorder %s628_s28, %s628_s28 }
   0x8   :  { %p635_p3 = por %p634_p2, %p633_p1 }
   0xa   :  { %p636_p4 = pnand %p635_p3, %p629_p0 }
   0xc   :  { %639 = shalt.err (!%p636_p4)
}
   0xd   :  { %s730_s29 = smov 64   ;;  %s731_s30 = smov 4  }
   0xe   :  { %39 = dma.hbm_to_vmem [thread:$0]  %s847_s1, 1024, %s34_s25, [#allocation6], %s730_s29, %s730_s29, %s731_s30  }
   0xf   :  { %s648_s10 = scalar_lea.vmem %s22_s27, 128  ;;  %p653_p6 = scmp.lt.s32.totalorder %s22_s27, %s22_s27 }
  0x10   :  { %p649_p5 = scmp.ne.s32.totalorder %s22_s27, %s648_s10  ;;  %p654_p7 = scmp.lt.s32.totalorder %s648_s10, %s648_s10 }
  0x12   :  { %p655_p8 = por %p654_p7, %p653_p6 }
  0x14   :  { %p656_p9 = pnand %p655_p8, %p649_p5 }
  0x16   :  { %659 = shalt.err (!%p656_p9)
}
  0x17   :  { %27 = dma.hbm_to_vmem [thread:$0]  %s846_s0, 128, %s22_s27, [#allocation3], %s730_s29, %s730_s29, %s731_s30  }
  0x18   :  { %s732_s13 = smov [#allocation7]   ;;  %s733_s15 = smov [#allocation8]  }
  0x19   :  { %s47_s14 = sshll.u32 %s732_s13, 4  ;;  %s61_s16 = sshll.u32 %s733_s15, 4  ;;  %s48_s14 = int_to_ptr.vmem [resolvable:$true] %s47_s14  ;;  %s62_s16 = int_to_ptr.vmem [resolvable:$true] %s61_s16 }
  0x1a   :  { %s668_s1 = scalar_lea.vmem %s48_s14, 1024  ;;  %p673_p11 = scmp.lt.s32.totalorder %s48_s14, %s48_s14 }
  0x1b   :  { %p669_p10 = scmp.ne.s32.totalorder %s48_s14, %s668_s1  ;;  %p674_p12 = scmp.lt.s32.totalorder %s668_s1, %s668_s1 }
  0x1d   :  { %p675_p13 = por %p674_p12, %p673_p11 }
  0x1f   :  { %p676_p0 = pnand %p675_p13, %p669_p10 }
  0x21   :  { %679 = shalt.err (!%p676_p0)
}
  0x22   :  { %53 = dma.hbm_to_vmem [thread:$0]  %s849_s3, 1024, %s48_s14, [#allocation6], %s730_s29, %s730_s29, %s731_s30  }
  0x23   :  { %s688_s0 = scalar_lea.vmem %s62_s16, 1024  ;;  %p693_p2 = scmp.lt.s32.totalorder %s62_s16, %s62_s16 }
  0x24   :  { %p689_p1 = scmp.ne.s32.totalorder %s62_s16, %s688_s0  ;;  %p694_p3 = scmp.lt.s32.totalorder %s688_s0, %s688_s0 }
  0x26   :  { %p695_p4 = por %p694_p3, %p693_p2 }
  0x28   :  { %p696_p5 = pnand %p695_p4, %p689_p1 }
  0x2a   :  { %699 = shalt.err (!%p696_p5)
}
  0x2b   :  { %67 = dma.hbm_to_vmem [thread:$0]  %s851_s5, 1024, %s62_s16, [#allocation9], %s730_s29, %s730_s29, %s731_s30  }
  0x2c   :  { %720 = dma.done.wait [#allocation3], 128  }
  0x2d   :  { %721 = vsyncadd [#allocation3], 4294967168 }
  0x2e   :  { %722 = dma.done.wait [#allocation6], 2048  }
  0x2f   :  { %723 = vsyncadd [#allocation6], 4294965248 }
  0x30   :  { %724 = dma.done.wait [#allocation9], 1024  }
  0x31   :  { %725 = vsyncadd [#allocation9], 4294966272  ;;  %v734_v0 = vmov 0.0   ;;  %vm735_vm0 = vmmov 0   ;;  %v595_v1 = vld [vmem:[#allocation5 + $0x38] sm:$0xff]   ;;  %v596_v2 = vld [vmem:[#allocation5 + $0x30] sm:$0xff]  }
  0x32   :  { %526 = vmatprep.subr.bf16.mxu0 %v734_v0  ;;  %542 = vmatprep.mubr.msk.bf16.mxu0 %vm735_vm0, %v734_v0  ;;  %v597_v3 = vld [vmem:[#allocation5 + $0x28] sm:$0xff]   ;;  %v604_v4 = vld [vmem:[#allocation7 + $0x38] sm:$0xff]   ;;  %v598_v5 = vld [vmem:[#allocation5 + $0x20] sm:$0xff]   ;;  %s736_s24 = smov [#allocation10]  }
  0x33   :  { %546 = vmatprep.subr.bf16.mxu1 %v734_v0  ;;  %562 = vmatprep.mubr.msk.bf16.mxu1 %vm735_vm0, %v734_v0  ;;  %v605_v6 = vld [vmem:[#allocation7 + $0x30] sm:$0xff]   ;;  %v599_v7 = vld [vmem:[#allocation5 + $0x18] sm:$0xff]   ;;  %v606_v8 = vld [vmem:[#allocation7 + $0x28] sm:$0xff]   ;;  %s448_s25 = sshll.u32 %s736_s24, 4  ;;  %s449_s25 = int_to_ptr.vmem [resolvable:$true] %s448_s25 }
  0x34   :  { %527 = vmatpush3.bf16.msra.mxu0 %v595_v1  ;;  %547 = vmatpush3.bf16.msra.mxu1 %v604_v4  ;;  %v600_v9 = vld [vmem:[#allocation5 + $0x10] sm:$0xff]   ;;  %v607_v10 = vld [vmem:[#allocation7 + $0x20] sm:$0xff]   ;;  %v601_v11 = vld [vmem:[#allocation5 + $0x8] sm:$0xff]   ;;  %p705_p7 = scmp.lt.s32.totalorder %s449_s25, %s449_s25 }
  0x35   :  { %528 = vmatprep.subr.bf16.mxu0 %v734_v0  ;;  %548 = vmatprep.subr.bf16.mxu1 %v734_v0  ;;  %v608_v12 = vld [vmem:[#allocation7 + $0x18] sm:$0xff]   ;;  %v602_v13 = vld [vmem:[#allocation5] sm:$0xff]   ;;  %v609_v15 = vld [vmem:[#allocation7 + $0x10] sm:$0xff]  }
  0x36   :  { %v603_v14 = vld [vmem:[#allocation2] sm:$0xff]   ;;  %v610_v16 = vld [vmem:[#allocation7 + $0x8] sm:$0xff]   ;;  %v611_v17 = vld [vmem:[#allocation7] sm:$0xff]  }
  0x37   :  { %v612_v18 = vld [vmem:[#allocation8 + $0x38] sm:$0xff]   ;;  %v613_v19 = vld [vmem:[#allocation8 + $0x30] sm:$0xff]   ;;  %v614_v20 = vld [vmem:[#allocation8 + $0x28] sm:$0xff]  }
  0x38   :  { %529 = vmatpush3.bf16.msra.mxu0 %v596_v2  ;;  %549 = vmatpush3.bf16.msra.mxu1 %v605_v6  ;;  %v615_v21 = vld [vmem:[#allocation8 + $0x20] sm:$0xff]   ;;  %v616_v22 = vld [vmem:[#allocation8 + $0x18] sm:$0xff]   ;;  %v617_v33 = vld [vmem:[#allocation8 + $0x10] sm:$0xff]  }
  0x39   :  { %530 = vmatprep.subr.bf16.mxu0 %v734_v0  ;;  %550 = vmatprep.subr.bf16.mxu1 %v734_v0  ;;  %v462_v23 = vld [vmem:[%s848_s2] ss:$0 sm:$0xff]  ;;  %v618_v34 = vld [vmem:[#allocation8 + $0x8] sm:$0xff]   ;;  %v619_v35 = vld [vmem:[#allocation8] sm:$0xff]  }
  0x3a   :  { %v472_v36 = vld [vmem:[%s850_s4] ss:$0 sm:$0xff]  ;;  %s700_s4 = scalar_lea.vmem %s449_s25, 128 }
  0x3b   :  { %v481_v47 = vld [vmem:[%s852_s6] ss:$0 sm:$0xff]  ;;  %p701_p6 = scmp.ne.s32.totalorder %s449_s25, %s700_s4  ;;  %p706_p8 = scmp.lt.s32.totalorder %s700_s4, %s700_s4 }
  0x3c   :  { %531 = vmatpush3.bf16.msra.mxu0 %v597_v3  ;;  %551 = vmatpush3.bf16.msra.mxu1 %v606_v8 }
  0x3d   :  { %532 = vmatprep.subr.bf16.mxu0 %v734_v0  ;;  %552 = vmatprep.subr.bf16.mxu1 %v734_v0  ;;  %p707_p9 = por %p706_p8, %p705_p7 }
  0x3f   :  { %p708_p10 = pnand %p707_p9, %p701_p6 }
  0x40   :  { %533 = vmatpush3.bf16.msra.mxu0 %v598_v5  ;;  %553 = vmatpush3.bf16.msra.mxu1 %v607_v10 }
  0x41   :  { %534 = vmatprep.subr.bf16.mxu0 %v734_v0  ;;  %554 = vmatprep.subr.bf16.mxu1 %v734_v0 }
  0x44   :  { %535 = vmatpush3.bf16.msra.mxu0 %v599_v7  ;;  %555 = vmatpush3.bf16.msra.mxu1 %v608_v12 }
  0x45   :  { %536 = vmatprep.subr.bf16.mxu0 %v734_v0  ;;  %556 = vmatprep.subr.bf16.mxu1 %v734_v0 }
  0x48   :  { %537 = vmatpush3.bf16.msra.mxu0 %v600_v9  ;;  %557 = vmatpush3.bf16.msra.mxu1 %v609_v15 }
  0x49   :  { %538 = vmatprep.subr.bf16.mxu0 %v734_v0  ;;  %558 = vmatprep.subr.bf16.mxu1 %v734_v0 }
  0x4c   :  { %539 = vmatpush3.bf16.msra.mxu0 %v601_v11  ;;  %559 = vmatpush3.bf16.msra.mxu1 %v610_v16 }
  0x4d   :  { %540 = vmatprep.subr.bf16.mxu0 %v734_v0  ;;  %560 = vmatprep.subr.bf16.mxu1 %v734_v0 }
  0x50   :  { %541 = vmatpush3.bf16.msra.mxu0 %v602_v13  ;;  %561 = vmatpush3.bf16.msra.mxu1 %v611_v17 }
  0x51   :  { %566 = vmatprep.subr.bf16.mxu0 %v734_v0 }
  0x53   :  { %543 = vmatmul.mubr.bf16.vlgmr.msra.gmra.mxu0 %v603_v14 }
  0x54   :  { %582 = vmatprep.mubr.msk.bf16.mxu0 %vm735_vm0, %v734_v0  ;;  %567 = vmatpush3.bf16.msra.mxu0 %v612_v18 }
  0x55   :  { %568 = vmatprep.subr.bf16.mxu0 %v734_v0 }
  0x58   :  { %569 = vmatpush3.bf16.msra.mxu0 %v613_v19 }
  0x59   :  { %570 = vmatprep.subr.bf16.mxu0 %v734_v0 }
  0x5c   :  { %571 = vmatpush3.bf16.msra.mxu0 %v614_v20 }
  0x5d   :  { %572 = vmatprep.subr.bf16.mxu0 %v734_v0 }
  0x60   :  { %573 = vmatpush3.bf16.msra.mxu0 %v615_v21 }
  0x61   :  { %574 = vmatprep.subr.bf16.mxu0 %v734_v0 }
  0x64   :  { %575 = vmatpush3.bf16.msra.mxu0 %v616_v22 }
  0x65   :  { %576 = vmatprep.subr.bf16.mxu0 %v734_v0 }
  0x68   :  { %577 = vmatpush3.bf16.msra.mxu0 %v617_v33 }
  0x69   :  { %578 = vmatprep.subr.bf16.mxu0 %v734_v0 }
  0x6c   :  { %579 = vmatpush3.bf16.msra.mxu0 %v618_v34 }
  0x6d   :  { %580 = vmatprep.subr.bf16.mxu0 %v734_v0 }
  0x70   :  { %581 = vmatpush3.bf16.msra.mxu0 %v619_v35 }
 0x113   :  { %v196_v24 = vpop.f32.mrf.mxu0 }
 0x114   :  { %v197_v26 = vadd.f32 %v462_v23, %v196_v24 }
 0x115   :  { %v544_v25 = vpop.f32.mrf.mxu0 }
 0x116   :  { %v203_v30 = vmax.f32 %v197_v26, 0.0 }
 0x117   :  { %v199_v27 = vpop.f32.mrf.mxu0 }
 0x118   :  { %v200_v28 = vadd.f32 %v462_v23, %v199_v27 }
 0x119   :  { %v545_v29 = vpop.f32.mrf.mxu0 }
 0x11a   :  { %v204_v31 = vmax.f32 %v200_v28, 0.0 }
 0x11c   :  { %v205_v32 = vpack.c.bf16 %v204_v31, %v203_v30 }
 0x11e   :  { %563 = vmatmul.mubr.bf16.vlgmr.msra.gmra.mxu1 %v205_v32 }
 0x1de   :  { %v311_v37 = vpop.f32.mrf.mxu1 }
 0x1df   :  { %v312_v39 = vadd.f32 %v472_v36, %v311_v37 }
 0x1e0   :  { %v564_v38 = vpop.f32.mrf.mxu1 }
 0x1e1   :  { %v318_v43 = vmax.f32 %v312_v39, 0.0 }
 0x1e2   :  { %v314_v40 = vpop.f32.mrf.mxu1 }
 0x1e3   :  { %v315_v41 = vadd.f32 %v472_v36, %v314_v40 }
 0x1e4   :  { %v565_v42 = vpop.f32.mrf.mxu1 }
 0x1e5   :  { %v319_v44 = vmax.f32 %v315_v41, 0.0 }
 0x1e7   :  { %v320_v45 = vpack.c.bf16 %v319_v44, %v318_v43 }
 0x1e9   :  { %583 = vmatmul.mubr.bf16.vlgmr.msra.gmra.mxu0 %v320_v45 }
 0x2a9   :  { %v426_v46 = vpop.f32.mrf.mxu0 }
 0x2aa   :  { %v427_v50 = vadd.f32 %v481_v47, %v426_v46 }
 0x2ab   :  { %v584_v48 = vpop.f32.mrf.mxu0 }
 0x2ad   :  { %v429_v49 = vpop.f32.mrf.mxu0 }
 0x2ae   :  { %v430_v51 = vadd.f32 %v481_v47, %v429_v49 }
 0x2af   :  { %v585_v52 = vpop.f32.mrf.mxu0 }
 0x2b0   :  { %v497_v53 = vpack.c.bf16 %v430_v51, %v427_v50 }
 0x2b2   :  { %498 = vst [vmem:[#allocation10] sm:$0xff] %v497_v53  }
 0x2b3   :  { %711 = shalt.err (!%p708_p10)
}
 0x2b4   :  { %454 = dma.vmem_to_hbm [thread:$0]  %s449_s25, 128, %s853_s7, [#allocation4], %s730_s29, %s730_s29, %s731_s30  }
 0x2b5   :  { %726 = dma.done.wait [#allocation4], 128  }
 0x2b6   :  { %727 = vsyncadd [#allocation4], 4294967168 }
 0x2b7   :  { %458 = vsyncpa [#allocation3], 1 }
 0x2b8   :  { %459 = vsyncpa [#allocation6], 1 }
 0x2b9   :  { %460 = vsyncpa [#allocation9], 1 }
 0x2ba   :  { %461 = vsyncpa [#allocation4], 1 }

</bundles_post_ra>
